<compile_context>
chip_gen: v7x
topology: tpu7x:2x2x1
jax: 0.10.0
libtpu: 0.0.40
codegen_flags: <defaults>
</compile_context>

<pallas_src>
import functools
import math

import jax
import jax.numpy as jnp
from jax.experimental import pallas as pl
from jax.experimental.pallas import tpu as pltpu


def _round_up(x, m):
    return (x + m - 1) // m * m


def _lcm(a, b):
    return a * b // math.gcd(a, b)


# ---------------------------------------------------------------------------
# Kernel 1: fused per-node projection (one MXU matmul, K = d_in_pad, N = 2*d_pad)
#   p   = x @ [W_l | W_r]
#   p_l = p[:, :d_pad]              (neighbour projection, bf16)
#   p_r = p[:, d_pad:] + b          (root projection + bias, bf16)
# ---------------------------------------------------------------------------
def sage_project_kernel(x_ref, w_ref, b_ref, p_l_ref, p_r_ref, *, d_pad):
    p = jnp.dot(x_ref[...], w_ref[...], preferred_element_type=jnp.float32)
    p_l_ref[...] = p[:, :d_pad].astype(p_l_ref.dtype)
    p_r_ref[...] = (p[:, d_pad:] + b_ref[...]).astype(p_r_ref.dtype)


# ---------------------------------------------------------------------------
# Kernel 2: tiled mean-aggregation + combine + activation
#   out[i] = act( inv_deg[i] * sum_k counts[i, k] @ p_l[k]  +  p_r[i] )
# grid = (row tiles "parallel", reduction tiles "arbitrary")
# ---------------------------------------------------------------------------
def sage_agg_kernel(a_ref, p_l_ref, p_r_ref, inv_deg_ref, o_ref, acc_ref, *,
                    tk, d_valid, activation, p_l_resident, finalize_rows):
    k = pl.program_id(1)

    @pl.when(k == 0)
    def _():
        acc_ref[...] = jnp.zeros_like(acc_ref)

    if p_l_resident:
        # p_l is fully VMEM-resident; slice the current reduction tile.
        start = pl.multiple_of(k * tk, tk)
        p_l_blk = p_l_ref[pl.ds(start, tk), :]
    else:
        p_l_blk = p_l_ref[...]

    # O(N^2) term: aggregate the already-projected (small) features.
    acc_ref[...] += jnp.dot(a_ref[...], p_l_blk,
                            preferred_element_type=jnp.float32)

    @pl.when(k == pl.num_programs(1) - 1)
    def _():
        tm = acc_ref.shape[0]
        # Chunked epilogue keeps vreg pressure low at tm=512.
        for r0 in range(0, tm, finalize_rows):
            r1 = r0 + finalize_rows
            h = (acc_ref[r0:r1, :] * inv_deg_ref[r0:r1, :]
                 + p_r_ref[r0:r1, :].astype(jnp.float32))
            if activation == "relu":
                h = jnp.maximum(h, 0.0)
            elif activation == "log_softmax":
                # mask padded lanes so they do not contribute to the reduction
                cols = jax.lax.broadcasted_iota(jnp.int32, h.shape, 1)
                h = jnp.where(cols < d_valid, h, -jnp.inf)
                m = jnp.max(h, axis=1, keepdims=True)
                s = h - m
                lse = jnp.log(jnp.sum(jnp.exp(s), axis=1, keepdims=True))
                h = s - lse
            o_ref[r0:r1, :] = h.astype(o_ref.dtype)


def sage_layer(a_counts, inv_deg, x_bf16, w_cat, b, *, d_valid, activation,
               out_dtype, tm=512, tk=1024, tm_proj=256, finalize_rows=128,
               vmem_resident_budget=24 << 20):
    """One SAGEConv layer on padded, lane-dense operands.

    a_counts : (n_pad, n_pad)    raw edge counts (exact in bf16)
    inv_deg  : (n_pad, 1)        fp32 per-row 1/deg normalization
    x_bf16   : (n_pad, d_in_pad) node features, bf16
    w_cat    : (d_in_pad, 2*d_pad) = [W_l | W_r], bf16
    b        : (1, d_pad) bias, f32
    """
    n_pad, d_in_pad = x_bf16.shape
    two_d_pad = w_cat.shape[1]
    d_pad = two_d_pad // 2

    tm = min(tm, n_pad)
    tk = min(tk, n_pad)
    tm_proj = min(tm_proj, n_pad)
    finalize_rows = min(finalize_rows, tm)
    assert n_pad % tm == 0 and n_pad % tk == 0 and n_pad % tm_proj == 0
    assert tm % finalize_rows == 0

    out_bytes = jnp.dtype(out_dtype).itemsize

    # --- projection: p_l = x @ W_l, p_r = x @ W_r + b  (both bf16) -----------
    proj_vmem = (2 * tm_proj * d_in_pad * 2       # x tiles (bf16, 2 buffers)
                 + 2 * d_in_pad * two_d_pad * 2   # weight (bf16, 2 buffers)
                 + 2 * 8 * 128 * 4                # bias (padded)
                 + 2 * 2 * tm_proj * d_pad * 2)   # two bf16 outputs
    proj_vmem_limit = min(max(int(proj_vmem * 1.5) + (4 << 20), 32 << 20),
                          56 << 20)

    p_l, p_r = pl.pallas_call(
        functools.partial(sage_project_kernel, d_pad=d_pad),
        out_shape=(jax.ShapeDtypeStruct((n_pad, d_pad), jnp.bfloat16),
                   jax.ShapeDtypeStruct((n_pad, d_pad), jnp.bfloat16)),
        grid=(n_pad // tm_proj,),
        in_specs=[
            pl.BlockSpec((tm_proj, d_in_pad), lambda i: (i, 0)),
            pl.BlockSpec((d_in_pad, two_d_pad), lambda i: (0, 0)),
            pl.BlockSpec((1, d_pad), lambda i: (0, 0)),
        ],
        out_specs=(
            pl.BlockSpec((tm_proj, d_pad), lambda i: (i, 0)),
            pl.BlockSpec((tm_proj, d_pad), lambda i: (i, 0)),
        ),
        compiler_params=pltpu.CompilerParams(
            dimension_semantics=("parallel",),
            vmem_limit_bytes=proj_vmem_limit),
    )(x_bf16, w_cat, b)

    # --- aggregation: out = act(inv_deg * (counts @ p_l) + p_r) --------------
    p_l_res_bytes = 2 * n_pad * d_pad * 2          # fully-resident p_l (2 bufs)
    fixed_bytes = (2 * tm * tk * 2                 # A tiles (bf16, 2 buffers)
                   + 2 * tm * d_pad * 2            # p_r tiles (bf16)
                   + 2 * tm * 128 * 4              # inv_deg tiles (lane padded)
                   + 2 * tm * d_pad * out_bytes    # output tiles
                   + tm * d_pad * 4)               # fp32 accumulator scratch
    p_l_resident = (p_l_res_bytes + fixed_bytes) <= vmem_resident_budget

    if p_l_resident:
        p_l_spec = pl.BlockSpec((n_pad, d_pad), lambda i, k: (0, 0))
        agg_vmem = fixed_bytes + p_l_res_bytes
    else:
        p_l_spec = pl.BlockSpec((tk, d_pad), lambda i, k: (k, 0))
        agg_vmem = fixed_bytes + 2 * tk * d_pad * 2
    agg_vmem_limit = min(max(int(agg_vmem * 1.5) + (4 << 20), 32 << 20),
                         56 << 20)

    out = pl.pallas_call(
        functools.partial(sage_agg_kernel, tk=tk, d_valid=d_valid,
                          activation=activation, p_l_resident=p_l_resident,
                          finalize_rows=finalize_rows),
        out_shape=jax.ShapeDtypeStruct((n_pad, d_pad), out_dtype),
        grid=(n_pad // tm, n_pad // tk),
        in_specs=[
            pl.BlockSpec((tm, tk), lambda i, k: (i, k)),      # A counts tile
            p_l_spec,                                         # p_l (resident/stream)
            pl.BlockSpec((tm, d_pad), lambda i, k: (i, 0)),   # p_r (row tile)
            pl.BlockSpec((tm, 1), lambda i, k: (i, 0)),       # inv_deg (row tile)
        ],
        out_specs=pl.BlockSpec((tm, d_pad), lambda i, k: (i, 0)),
        scratch_shapes=[pltpu.VMEM((tm, d_pad), jnp.float32)],
        compiler_params=pltpu.CompilerParams(
            dimension_semantics=("parallel", "arbitrary"),
            vmem_limit_bytes=agg_vmem_limit),
    )(a_counts, p_l, p_r, inv_deg)
    return out


# ---------------------------------------------------------------------------
# Plain-JAX glue
# ---------------------------------------------------------------------------
def build_adjacency_counts(edge_index, num_nodes, padded_nodes=None):
    """Dense edge-count matrix counts[i, j] = #(j->i), plus fp32 1/deg_in(i).
    Counts are small integers -> exactly representable in bf16.  Nodes with no
    incoming edges aggregate to zeros (PyG scatter-mean semantics)."""
    if padded_nodes is None:
        padded_nodes = num_nodes
    src, dst = edge_index[0], edge_index[1]
    counts = jnp.zeros((padded_nodes, padded_nodes), jnp.float32)
    counts = counts.at[dst, src].add(1.0)
    deg = jnp.sum(counts, axis=1, keepdims=True)
    inv_deg = 1.0 / jnp.maximum(deg, 1.0)
    return counts.astype(jnp.bfloat16), inv_deg


def _fuse_pad_weights(w_l, w_r, d_in_pad, d_out_pad):
    """Pack [W_l | W_r] into one bf16 (d_in_pad, 2*d_out_pad) matrix."""
    d_in, d_out = w_l.shape
    w = jnp.zeros((d_in_pad, 2 * d_out_pad), jnp.float32)
    w = w.at[:d_in, :d_out].set(w_l)
    w = w.at[:d_in, d_out_pad:d_out_pad + d_out].set(w_r)
    return w.astype(jnp.bfloat16)


def _pad_bias(b, d_out_pad):
    d_out = b.shape[1]
    return jnp.zeros((1, d_out_pad), jnp.float32).at[:, :d_out].set(b)


def graphsage_forward(x, edge_index, params, *, tm=512, tk=1024):
    """Eval-mode forward: dropout(id) -> sage1 -> relu -> dropout(id) ->
    sage2 -> log_softmax."""
    n, d_in = x.shape
    d_h = params["w_l1"].shape[1]
    d_out = params["w_l2"].shape[1]

    # Clamp tiles to the problem size, then pad N so both tiles divide it.
    tm = min(tm, _round_up(n, 256))
    tk = min(tk, _round_up(n, 256))
    n_pad = _round_up(n, _lcm(256, _lcm(tm, tk)))
    d_in_pad = _round_up(d_in, 128)
    d_h_pad = _round_up(d_h, 128)
    d_out_pad = _round_up(d_out, 128)

    # padded, bf16 operands (halves HBM traffic for the O(N^2) adjacency)
    x_p = jnp.zeros((n_pad, d_in_pad), jnp.float32).at[:n, :d_in].set(x)
    x_bf = x_p.astype(jnp.bfloat16)
    a_counts, inv_deg = build_adjacency_counts(edge_index, n, n_pad)

    w1 = _fuse_pad_weights(params["w_l1"], params["w_r1"], d_in_pad, d_h_pad)
    b1 = _pad_bias(params["b1"], d_h_pad)
    w2 = _fuse_pad_weights(params["w_l2"], params["w_r2"], d_h_pad, d_out_pad)
    b2 = _pad_bias(params["b2"], d_out_pad)

    h = sage_layer(a_counts, inv_deg, x_bf, w1, b1, d_valid=d_h,
                   activation="relu", out_dtype=jnp.bfloat16, tm=tm, tk=tk)
    out = sage_layer(a_counts, inv_deg, h, w2, b2, d_valid=d_out,
                     activation="log_softmax", out_dtype=jnp.float32,
                     tm=tm, tk=tk)
    return out[:n, :d_out]


def reference_forward(x, edge_index, params):
    """Pure-JAX fp32 reference of the same forward pass."""
    n = x.shape[0]
    counts, inv_deg = build_adjacency_counts(edge_index, n)
    a = counts.astype(jnp.float32) * inv_deg

    def layer(a, x, wl, wr, b):
        return a @ (x @ wl) + x @ wr + b

    h = jnp.maximum(layer(a, x, params["w_l1"], params["w_r1"],
                          params["b1"]), 0.0)
    z = layer(a, h, params["w_l2"], params["w_r2"], params["b2"])
    return jax.nn.log_softmax(z, axis=1)


def init_params(key, dim_in, dim_h, dim_out):
    ks = jax.random.split(key, 4)

    def glorot(k, fan_in, fan_out):
        scale = jnp.sqrt(2.0 / (fan_in + fan_out))
        return scale * jax.random.normal(k, (fan_in, fan_out), jnp.float32)

    return {
        # SAGEConv1: lin_l (neighbor, with bias) + lin_r (root, no bias)
        "w_l1": glorot(ks[0], dim_in, dim_h),
        "w_r1": glorot(ks[1], dim_in, dim_h),
        "b1": jnp.zeros((1, dim_h), jnp.float32),
        # SAGEConv2
        "w_l2": glorot(ks[2], dim_h, dim_out),
        "w_r2": glorot(ks[3], dim_h, dim_out),
        "b2": jnp.zeros((1, dim_out), jnp.float32),
    }


if __name__ == "__main__":
    # Small synthetic graph consistent with the module's forward signature:
    # x: [num_nodes, dim_in], edge_index: [2, num_edges].
    # 1100 nodes with tm=256 / tk=512 -> n_pad=1536, a (6, 3) aggregation grid,
    # exercising the parallel row axis, the "arbitrary" reduction axis with the
    # fp32 accumulator, padded rows/columns, and the resident-p_l path.
    num_nodes = 1100
    num_edges = 6000
    dim_in, dim_h, dim_out = 32, 64, 8

    key = jax.random.PRNGKey(0)
    k_x, k_src, k_dst, k_params = jax.random.split(key, 4)

    x = jax.random.normal(k_x, (num_nodes, dim_in), jnp.float32)
    src = jax.random.randint(k_src, (num_edges,), 0, num_nodes, jnp.int32)
    dst = jax.random.randint(k_dst, (num_edges,), 0, num_nodes, jnp.int32)
    edge_index = jnp.stack([src, dst], axis=0)

    params = init_params(k_params, dim_in, dim_h, dim_out)

    # TODO(synk): training-mode dropout / optimizer / NeighborLoader pipeline
    # are not part of the inference hot path and are not implemented here.
    out = graphsage_forward(x, edge_index, params, tm=256, tk=512)
    out = jax.block_until_ready(out)

    assert out.shape == (num_nodes, dim_out)
    # rows of log_softmax should sum (in prob space) to ~1
    assert jnp.allclose(jnp.sum(jnp.exp(out), axis=1), 1.0, atol=1e-3)
    # compare against the fp32 pure-JAX reference (bf16 inputs -> loose tol)
    ref = reference_forward(x, edge_index, params)
    max_err = float(jnp.max(jnp.abs(out - ref)))
    assert max_err < 0.2, f"max abs error vs reference: {max_err}"
    print("KERNEL_OK")
</pallas_src>

<mosaic_0001>
module attributes {stable_mosaic.version = 11 : i64} {
  func.func @sage_project_kernel(%arg0: i32, %arg1: memref<256x128xbf16, #tpu.memory_space<vmem>>, %arg2: memref<128x256xbf16, #tpu.memory_space<vmem>>, %arg3: memref<1x128xf32, #tpu.memory_space<vmem>>, %arg4: memref<256x128xbf16, #tpu.memory_space<vmem>>, %arg5: memref<256x128xbf16, #tpu.memory_space<vmem>>) attributes {dimension_semantics = [#tpu.dimension_semantics<parallel>], iteration_bounds = array<i64: 6>, scalar_prefetch = 0 : i64, scratch_operands = 0 : i64, tpu.core_type = #tpu.core_type<tc>, window_params = [{transform_indices = @transform_0, window_bounds = array<i64: 256, 128>}, {pipeline_mode = #tpu.pipeline_mode<synchronous>, transform_indices = @transform_1, window_bounds = array<i64: 128, 256>}, {pipeline_mode = #tpu.pipeline_mode<synchronous>, transform_indices = @transform_2, window_bounds = array<i64: 1, 128>}, {transform_indices = @transform_3, window_bounds = array<i64: 256, 128>}, {transform_indices = @transform_4, window_bounds = array<i64: 256, 128>}]} {
    %c0 = arith.constant 0 : index
    %c0_0 = arith.constant 0 : index
    %0 = vector.load %arg1[%c0, %c0_0] : memref<256x128xbf16, #tpu.memory_space<vmem>>, vector<256x128xbf16>
    %c0_1 = arith.constant 0 : index
    %c0_2 = arith.constant 0 : index
    %1 = vector.load %arg2[%c0_1, %c0_2] : memref<128x256xbf16, #tpu.memory_space<vmem>>, vector<128x256xbf16>
    %cst = arith.constant dense<0.000000e+00> : vector<256x256xf32>
    %2 = tpu.matmul %0, %1, %cst {dimension_numbers = #tpu.dot_dimension_numbers<[1], [0], [0], [1], [0, 0, 1, 1], [], []>} : vector<256x128xbf16>, vector<128x256xbf16>, vector<256x256xf32> -> vector<256x256xf32>
    %3 = vector.extract_strided_slice %2 {offsets = [0, 0], sizes = [256, 128], strides = [1, 1]} : vector<256x256xf32> to vector<256x128xf32>
    %4 = arith.truncf %3 : vector<256x128xf32> to vector<256x128xbf16>
    %c0_3 = arith.constant 0 : index
    %c0_4 = arith.constant 0 : index
    %5 = vector.load %arg4[%c0_3, %c0_4] : memref<256x128xbf16, #tpu.memory_space<vmem>>, vector<256x128xbf16>
    tpu.vector_store %arg4[%c0_3, %c0_4], %4 {strides = array<i32>} : memref<256x128xbf16, #tpu.memory_space<vmem>>, vector<256x128xbf16>,
    %6 = vector.extract_strided_slice %2 {offsets = [0, 128], sizes = [256, 128], strides = [1, 1]} : vector<256x256xf32> to vector<256x128xf32>
    %c0_5 = arith.constant 0 : index
    %c0_6 = arith.constant 0 : index
    %7 = vector.load %arg3[%c0_5, %c0_6] : memref<1x128xf32, #tpu.memory_space<vmem>>, vector<1x128xf32>
    %8 = vector.broadcast %7 : vector<1x128xf32> to vector<256x128xf32>
    %9 = arith.addf %6, %8 : vector<256x128xf32>
    %10 = arith.truncf %9 : vector<256x128xf32> to vector<256x128xbf16>
    %c0_7 = arith.constant 0 : index
    %c0_8 = arith.constant 0 : index
    %11 = vector.load %arg5[%c0_7, %c0_8] : memref<256x128xbf16, #tpu.memory_space<vmem>>, vector<256x128xbf16>
    tpu.vector_store %arg5[%c0_7, %c0_8], %10 {strides = array<i32>} : memref<256x128xbf16, #tpu.memory_space<vmem>>, vector<256x128xbf16>,
    return
  }
  func.func @transform_0(%arg0: i32) -> (i32, i32) {
    %c0_i32 = arith.constant 0 : i32
    %c0_i32_0 = arith.constant 0 : i32
    return %arg0, %c0_i32 : i32, i32
  }
  func.func @transform_1(%arg0: i32) -> (i32, i32) {
    %c0_i32 = arith.constant 0 : i32
    %c0_i32_0 = arith.constant 0 : i32
    %c0_i32_1 = arith.constant 0 : i32
    return %c0_i32, %c0_i32_0 : i32, i32
  }
  func.func @transform_2(%arg0: i32) -> (i32, i32) {
    %c0_i32 = arith.constant 0 : i32
    %c0_i32_0 = arith.constant 0 : i32
    %c0_i32_1 = arith.constant 0 : i32
    return %c0_i32, %c0_i32_0 : i32, i32
  }
  func.func @transform_3(%arg0: i32) -> (i32, i32) {
    %c0_i32 = arith.constant 0 : i32
    %c0_i32_0 = arith.constant 0 : i32
    return %arg0, %c0_i32 : i32, i32
  }
  func.func @transform_4(%arg0: i32) -> (i32, i32) {
    %c0_i32 = arith.constant 0 : i32
    %c0_i32_0 = arith.constant 0 : i32
    return %arg0, %c0_i32 : i32, i32
  }
}

</mosaic_0001>

<bundles_post_ra>
// kernel: tpu_custom_call.1
= control target key start
LH: loop header
LB: loop body
LE: loop exit
PB: predicated region body
PF: predicated region fallthrough
CT: control target
= control target key end

     0   :  { %10 = vsyncpa [#allocation3], 0  ;;  %s2212_s0 = inlined_call_operand.hbm [shape: bf16[1536,128], index: 0, kind: input, shape index: {}]   ;;  %s2213_s1 = inlined_call_operand.hbm [shape: bf16[128,256], index: 1, kind: input, shape index: {}]   ;;  %s2214_s2 = inlined_call_operand.vmem [shape: f32[1,128], index: 2, kind: input, shape index: {}]   ;;  %s2215_s3 = inlined_call_operand.hbm [shape: bf16[1536,128], index: 3, kind: output, shape index: {0}]   ;;  %s2216_s4 = inlined_call_operand.hbm [shape: bf16[1536,128], index: 4, kind: output, shape index: {1}]  }
   0x1   :  { %12 = vsyncpa [#allocation3 + $0x1], 0 }
   0x2   :  { %13 = vsyncpa [#allocation6], 0 }
   0x3   :  { %14 = vsyncpa [#allocation4], 0 }
   0x4   :  { %16 = vsyncpa [#allocation4 + $0x1], 0 }
   0x5   :  { %17 = vsyncpa [#allocation9], 0 }
   0x6   :  { %19 = vsyncpa [#allocation9 + $0x1], 0  ;;  %s1869_s15 = smov 0   ;;  %s1871_s16 = smov 0  }
   0x7   :  { %s1873_s17 = smov 0   ;;  %s1875_s18 = smov 0  }
   0x8 LB: > { %s1890_s19 = sadd.s32 4294967295, %s1831_s18   ;;  %s1172_s20 = sadd.s32 4294967294, %s1831_s18   ;;  %s1831_s18 = sphi %s1875_s18, %s2235_s18   ;;  %s1827_s17 = sphi %s1873_s17, %s2234_s17   ;;  %s1823_s16 = sphi %s1871_s16, %s2233_s16   ;;  %s1819_s15 = sphi %s1869_s15, %s2232_s15  }
   0x9   : > { %p45_p0 = scmp.ne.s32.totalorder %s1823_s16, %s1819_s15  ;;  %p2217_p1 = scmp.eq.s32.totalorder %s1890_s19, 0 }
   0xa   : > { %p117_p3 = scmp.eq.s32.totalorder %s1172_s20, 5  ;;  %p1173_p5 = scmp.ge.s32.totalorder %s1831_s18, 1 }
   0xb   : > { %p1899_p4 = por %p2217_p1, %p45_p0  ;;  %p150_p7 = scmp.lt.s32.totalorder %s1831_s18, 7 }
   0xc   : > { %p1904_p6 = por %p117_p3, %p45_p0  ;;  %s1833_s24 = smov [#allocation5]  }
   0xd   : > { %s2220_s21 = scalar_select %p1899_p4, 1, 0 }
   0xe   : > { %s2221_s22 = scalar_select %p1904_p6, 1, 0 }
   0xf   : > { %p1909_p8 = pnand %p1173_p5, %p150_p7  ;;  %s162_s25 = sshll.u32 %s1833_s24, 4  ;;  %s163_s25 = int_to_ptr.vmem [resolvable:$true] %s162_s25 }
  0x10   : > { %s1922_s27 = sadd.s32 1, %s1831_s18   ;;  %s32_s28 = sadd.s32 1, %s1827_s17 }
  0x11   : > { %s2222_s23 = scalar_select %p1909_p8, 1, 0 }
  0x12   : > { %p1572_p9 = pneg %p1909_p8  ;;  %s29_s29 = ssub.s32 %s1831_s18, %s1922_s27 }
  0x13   : > { %s1671_s6 = scalar_lea.hbm %s2213_s1, 2048 }
  0x14   : > { %p1917_p10 = pnand %p1572_p9, %p2217_p1  ;;  %p1672_p11 = scmp.ne.s32.totalorder %s2213_s1, %s1671_s6 }
  0x15   : > { %p1678_p3 = scmp.lt.u32.totalorder %s1671_s6, %s2213_s1 }
  0x16   : > { %p1673_p12 = pneg %p1917_p10 }
  0x18   : > { %p1674_p13 = pnand %p1673_p12, %p1672_p11 }
  0x1a   : > { %p1675_p0 = pneg %p1674_p13 }
  0x1c   : > { %p1680_p5 = pnand %p1678_p3, %p1675_p0 }
  0x1e   : > { %1683 = shalt.err (!%p1680_p5)
}
  0x1f   : > { %s1684_s11 = scalar_lea.vmem %s163_s25, 2048  ;;  %p1692_p2 = scmp.lt.s32.totalorder %s163_s25, %s163_s25 }
  0x20   : > { %p1685_p7 = scmp.ne.s32.totalorder %s163_s25, %s1684_s11  ;;  %p1693_p6 = scmp.lt.s32.totalorder %s1684_s11, %s1684_s11 }
  0x22   : > { %p1687_p9 = pnand %p1685_p7, %p1673_p12  ;;  %p1694_p4 = por %p1693_p6, %p1692_p2 }
  0x24   : > { %p1688_p1 = pneg %p1687_p9 }
  0x26   : > { %p1695_p8 = pnand %p1694_p4, %p1688_p1 }
  0x28   : > { %1698 = shalt.err (!%p1695_p8)
}
  0x29   : > { %s1834_s12 = smov 128   ;;  %s1835_s13 = smov 8  }
  0x2a   : > { %1575 = dma.hbm_to_vmem [thread:$0]  (!%p1917_p10), %s2213_s1, 2048, %s163_s25, [#allocation6], %s1834_s12, %s1834_s12, %s1835_s13  }
  0x2b   : > { %p30_p11 = scmp.eq.s32.totalorder %s29_s29, 0  ;;  %p39_p2 = scmp.ne.s32.totalorder %s1827_s17, %s1823_s16 }
  0x2c   : > { %p40_p1 = scmp.eq.s32.totalorder %s1831_s18, 0  ;;  %p1588_p4 = scmp.lt.s32.totalorder %s1831_s18, 6 }
  0x2d   : > { %s1948_s24 = scalar_select %p30_p11, %s1827_s17, %s32_s28  }
  0x2e   : > { %p41_p6 = por %p40_p1, %p39_p2  ;;  %p2224_p8 = scmp.eq.s32.totalorder %s1890_s19, 5 }
  0x2f   : > { %s179_s5 = sand.u32 1, %s1827_s17   ;;  %s1289_s6 = sshll.u32 %s1831_s18, 11 }
  0x30   : > { %p1952_p12 = por %p2224_p8, %p39_p2  ;;  %s1176_s7 = sshll.u32 %s179_s5, 7 }
  0x31   : > { %s1961_s9 = scalar_lea.hbm %s2212_s0, %s1289_s6  ;;  %s183_s25 = scalar_lea.vmem [#allocation2], %s1176_s7 }
  0x32   : > { %s190_s28 = sshll.u32 %s183_s25, 4  ;;  %p1963_p10 = pnand %p1588_p4, %p41_p6  ;;  %s1967_s28 = int_to_ptr.vmem [resolvable:$true] %s190_s28 }
  0x33   : > { %s1969_s10 = scalar_lea.sflag [#allocation3], %s179_s5  ;;  %s1699_s11 = scalar_lea.hbm %s1961_s9, 2048 }
  0x34   : > { %p1700_p13 = scmp.ne.s32.totalorder %s1961_s9, %s1699_s11  ;;  %p1701_p0 = pneg %p1963_p10 }
  0x35   : > { %s1704_s14 = scalar_lea.hbm %s2212_s0, 12288  ;;  %p1705_p7 = scmp.lt.u32.totalorder %s1961_s9, %s2212_s0 }
  0x36   : > { %p1702_p3 = pnand %p1701_p0, %p1700_p13  ;;  %p1706_p9 = scmp.lt.u32.totalorder %s1704_s14, %s1699_s11 }
  0x37   : > { %p1708_p2 = scmp.lt.u32.totalorder %s1699_s11, %s1961_s9 }
  0x38   : > { %p1703_p5 = pneg %p1702_p3  ;;  %p1707_p11 = por %p1706_p9, %p1705_p7 }
  0x3a   : > { %p1709_p1 = por %p1708_p2, %p1707_p11 }
  0x3c   : > { %p1710_p4 = pnand %p1709_p1, %p1703_p5 }
  0x3e   : > { %1713 = shalt.err (!%p1710_p4)
}
  0x3f   : > { %s1714_s5 = scalar_lea.vmem %s1967_s28, 2048  ;;  %s1836_s7 = smov [#allocation2]  }
  0x40   : > { %p1715_p6 = scmp.ne.s32.totalorder %s1967_s28, %s1714_s5  ;;  %s1719_s26 = sshll.u32 %s1836_s7, 4  ;;  %s1720_s26 = int_to_ptr.vmem [resolvable:$false] %s1719_s26 }
  0x41   : > { %s1721_s8 = scalar_lea.vmem %s1720_s26, 4096  ;;  %p1722_p3 = scmp.lt.s32.totalorder %s1967_s28, %s1720_s26 }
  0x42   : > { %p1717_p8 = pnand %p1715_p6, %p1701_p0  ;;  %p1723_p7 = scmp.lt.s32.totalorder %s1721_s8, %s1714_s5 }
  0x44   : > { %p1718_p13 = pneg %p1717_p8  ;;  %p1724_p9 = por %p1723_p7, %p1722_p3 }
  0x46   : > { %p1725_p11 = pnand %p1724_p9, %p1718_p13 }
  0x48   : > { %1728 = shalt.err (!%p1725_p11)
}
  0x49   : > { %s1837_s25 = smov 64   ;;  %s1838_s11 = smov 4  }
  0x4a   : > { %1579 = dma.hbm_to_vmem [thread:$0]  (!%p1963_p10), %s1961_s9, 2048, %s1967_s28, %s1969_s10, %s1837_s25, %s1837_s25, %s1838_s11  }
  0x4b   : > { %p2227_p0 = scmp.ne.s32.totalorder %s2222_s23, 0 }
  0x4c   : > { %s2000_s12 = sand.u32 (!%p2227_p0), 1, %s1823_s16   ;;  %p2228_p5 = scmp.ne.s32.totalorder (!%p2227_p0), %s2220_s21, 0 }
  0x4d   : > { %202 = sbr.rel (%p2227_p0) target bundleno = 433 (0x1b1), region = 32  ;;  %s2003_s13 = sshll.u32 (!%p2227_p0), %s2000_s12, 7 }
  0x4e   : > { %s205_s14 = scalar_lea.sflag (!%p2227_p0), [#allocation3], %s2000_s12  ;;  %s2007_s20 = scalar_lea.vmem (!%p2227_p0), [#allocation2], %s2003_s13 }
  0x54   : > { %1802 = dma.done.wait (%p2228_p5), %s205_s14, 2048  }
  0x55   : > { %1804 = vsyncadd (%p2228_p5), %s205_s14, 4294965248  ;;  %p2229_p10 = scmp.eq.s32.totalorder %s1890_s19, 0 }
  0x57   : > { %1806 = dma.done.wait (%p2229_p10), [#allocation6], 2048   ;;  %p2230_p2 = pmov %p2229_p10 }
  0x58   : > { %v1839_v0 = vmov 0   ;;  %v1631_v1 = vld [vmem:[#allocation5 + $0x4] ss:$8 sps:$4 sm:$0xff]   ;;  %v1633_v2 = vld [vmem:[#allocation5] ss:$8 sps:$4 sm:$0xff]   ;;  %v1659_v21 = vld [vmem:[%s2007_s20 + $0x10] sm:$0xff]  }
  0x59   : > { %1808 = vsyncadd (%p2230_p2), [#allocation6], 4294965248  ;;  %502 = vmatprep.mubr.bf16.mxu0 %v1839_v0  ;;  %582 = vmatprep.mubr.bf16.mxu1 %v1839_v0  ;;  %v1634_v3 = vld [vmem:[#allocation5 + $0x14] ss:$8 sps:$4 sm:$0xff]   ;;  %v1636_v4 = vld [vmem:[#allocation5 + $0x10] ss:$8 sps:$4 sm:$0xff]  }
  0x5a   : > { %470 = vmatprep.subr.bf16.mxu0 %v1631_v1  ;;  %1546 = vmatprep.subr.bf16.mxu1 %v1631_v1  ;;  %v1637_v5 = vld [vmem:[#allocation5 + $0x24] ss:$8 sps:$4 sm:$0xff]   ;;  %v1639_v6 = vld [vmem:[#allocation5 + $0x20] ss:$8 sps:$4 sm:$0xff]   ;;  %v1640_v7 = vld [vmem:[#allocation5 + $0x34] ss:$8 sps:$4 sm:$0xff]  }
  0x5b   : > { %471 = vmatpush1.bf16.msra.mxu0 %v1633_v2  ;;  %1554 = vmatpush1.bf16.msra.mxu1 %v1633_v2  ;;  %v1642_v8 = vld [vmem:[#allocation5 + $0x30] ss:$8 sps:$4 sm:$0xff]   ;;  %v1643_v9 = vld [vmem:[#allocation5 + $0x44] ss:$8 sps:$4 sm:$0xff]   ;;  %v1645_v10 = vld [vmem:[#allocation5 + $0x40] ss:$8 sps:$4 sm:$0xff]  }
  0x5c   : > { %472 = vmatprep.subr.bf16.mxu0 %v1634_v3  ;;  %1547 = vmatprep.subr.bf16.mxu1 %v1634_v3  ;;  %v1646_v11 = vld [vmem:[#allocation5 + $0x54] ss:$8 sps:$4 sm:$0xff]   ;;  %v1648_v12 = vld [vmem:[#allocation5 + $0x50] ss:$8 sps:$4 sm:$0xff]   ;;  %v1649_v13 = vld [vmem:[#allocation5 + $0x64] ss:$8 sps:$4 sm:$0xff]  }
  0x5d   : > { %v1651_v14 = vld [vmem:[#allocation5 + $0x60] ss:$8 sps:$4 sm:$0xff]   ;;  %v1652_v15 = vld [vmem:[#allocation5 + $0x74] ss:$8 sps:$4 sm:$0xff]   ;;  %v1654_v16 = vld [vmem:[#allocation5 + $0x70] ss:$8 sps:$4 sm:$0xff]  }
  0x5e   : > { %v1655_v17 = vld [vmem:[%s2007_s20] sm:$0xff]   ;;  %v1657_v19 = vld [vmem:[%s2007_s20 + $0x8] sm:$0xff]   ;;  %v1660_v22 = vld [vmem:[%s2007_s20 + $0x50] sm:$0xff]   ;;  %s2059_s9 = scalar_lea.vmem [#allocation7], %s2003_s13  ;;  %s2064_s28 = scalar_lea.vmem [#allocation8], %s2003_s13 }
  0x5f   : > { %473 = vmatpush1.bf16.msra.mxu0 %v1636_v4  ;;  %1555 = vmatpush1.bf16.msra.mxu1 %v1636_v4  ;;  %v1656_v18 = vld [vmem:[%s2007_s20 + $0x40] sm:$0xff]   ;;  %v1658_v20 = vld [vmem:[%s2007_s20 + $0x48] sm:$0xff]   ;;  %v1661_v23 = vld [vmem:[%s2007_s20 + $0x18] sm:$0xff]   ;;  %s1354_s29 = sshll.u32 %s1890_s19, 11  ;;  %s1041_s10 = sshll.u32 %s2059_s9, 4  ;;  %s2123_s10 = int_to_ptr.vmem [resolvable:$true] %s1041_s10 }
  0x60   : > { %474 = vmatprep.subr.bf16.mxu0 %v1637_v5  ;;  %1548 = vmatprep.subr.bf16.mxu1 %v1637_v5  ;;  %v1662_v24 = vld [vmem:[%s2007_s20 + $0x58] sm:$0xff]   ;;  %v1663_v25 = vld [vmem:[%s2007_s20 + $0x20] sm:$0xff]   ;;  %v1665_v27 = vld [vmem:[%s2007_s20 + $0x28] sm:$0xff]   ;;  %s2121_s7 = scalar_lea.hbm %s2215_s3, %s1354_s29  ;;  %s1057_s19 = sshll.u32 %s2064_s28, 4  ;;  %s2137_s19 = int_to_ptr.vmem [resolvable:$true] %s1057_s19 }
  0x61   : > { %v1664_v26 = vld [vmem:[%s2007_s20 + $0x60] sm:$0xff]   ;;  %v1666_v28 = vld [vmem:[%s2007_s20 + $0x68] sm:$0xff]   ;;  %v1667_v29 = vld [vmem:[%s2007_s20 + $0x30] sm:$0xff]   ;;  %s2135_s25 = scalar_lea.hbm %s2216_s4, %s1354_s29  ;;  %s1023_s11 = scalar_lea.sflag [#allocation4], %s2000_s12 }
  0x62   : > { %v1668_v30 = vld [vmem:[%s2007_s20 + $0x70] sm:$0xff]   ;;  %v1669_v31 = vld [vmem:[%s2007_s20 + $0x38] sm:$0xff]   ;;  %v2052_v36 = vld [vmem:[%s2214_s2] ss:$0 sm:$0xff]  ;;  %s1729_s13 = scalar_lea.vmem %s2123_s10, 2048  ;;  %s1840_s14 = smov [#allocation7]  }
  0x63   : > { %475 = vmatpush1.bf16.msra.mxu0 %v1639_v6  ;;  %1556 = vmatpush1.bf16.msra.mxu1 %v1639_v6  ;;  %v1670_v32 = vld [vmem:[%s2007_s20 + $0x78] sm:$0xff]   ;;  %p1730_p1 = scmp.ne.s32.totalorder %s2123_s10, %s1729_s13  ;;  %s1733_s20 = sshll.u32 %s1840_s14, 4  ;;  %s1734_s20 = int_to_ptr.vmem [resolvable:$false] %s1733_s20 }
  0x64   : > { %476 = vmatprep.subr.bf16.mxu0 %v1640_v7  ;;  %1549 = vmatprep.subr.bf16.mxu1 %v1640_v7  ;;  %s1735_s21 = scalar_lea.vmem %s1734_s20, 4096  ;;  %p1736_p8 = scmp.lt.s32.totalorder %s2123_s10, %s1734_s20 }
  0x65   : > { %p1731_p4 = pnand %p1730_p1, %p1952_p12  ;;  %p1737_p13 = scmp.lt.s32.totalorder %s1735_s21, %s1729_s13 }
  0x67   : > { %477 = vmatpush1.bf16.msra.mxu0 %v1642_v8  ;;  %1557 = vmatpush1.bf16.msra.mxu1 %v1642_v8  ;;  %p1732_p6 = pneg %p1731_p4  ;;  %p1738_p3 = por %p1737_p13, %p1736_p8 }
  0x68   : > { %478 = vmatprep.subr.bf16.mxu0 %v1643_v9  ;;  %1550 = vmatprep.subr.bf16.mxu1 %v1643_v9 }
  0x69   : > { %p1739_p7 = pnand %p1738_p3, %p1732_p6 }
  0x6b   : > { %479 = vmatpush1.bf16.msra.mxu0 %v1645_v10  ;;  %1558 = vmatpush1.bf16.msra.mxu1 %v1645_v10 }
  0x6c   : > { %480 = vmatprep.subr.bf16.mxu0 %v1646_v11  ;;  %1551 = vmatprep.subr.bf16.mxu1 %v1646_v11 }
  0x6f   : > { %481 = vmatpush1.bf16.msra.mxu0 %v1648_v12  ;;  %1559 = vmatpush1.bf16.msra.mxu1 %v1648_v12 }
  0x70   : > { %482 = vmatprep.subr.bf16.mxu0 %v1649_v13  ;;  %1552 = vmatprep.subr.bf16.mxu1 %v1649_v13 }
  0x73   : > { %483 = vmatpush1.bf16.msra.mxu0 %v1651_v14  ;;  %1560 = vmatpush1.bf16.msra.mxu1 %v1651_v14 }
  0x74   : > { %484 = vmatprep.subr.bf16.mxu0 %v1652_v15  ;;  %1553 = vmatprep.subr.bf16.mxu1 %v1652_v15 }
  0x77   : > { %485 = vmatpush1.bf16.msra.mxu0 %v1654_v16  ;;  %1561 = vmatpush1.bf16.msra.mxu1 %v1654_v16 }
  0x7a   : > { %503 = vmatmul.mubr.bf16.vlgmr.msra.gmra.mrb[0].mxu0 %v1655_v17  ;;  %583 = vmatmul.mubr.bf16.vlgmr.msra.gmra.mrb[0].mxu1 %v1656_v18 }
  0x7b   : > { %512 = vmatprep.mubr.bf16.mxu0 %v1839_v0  ;;  %592 = vmatprep.mubr.bf16.mxu1 %v1839_v0 }
  0x82   : > { %513 = vmatmul.mubr.bf16.gmra.mrb[4].mxu0 %v1657_v19  ;;  %593 = vmatmul.mubr.bf16.gmra.mrb[4].mxu1 %v1658_v20 }
  0x83   : > { %522 = vmatprep.mubr.bf16.mxu0 %v1839_v0  ;;  %602 = vmatprep.mubr.bf16.mxu1 %v1839_v0 }
  0x8a   : > { %523 = vmatmul.mubr.bf16.gmra.mrb[8].mxu0 %v1659_v21  ;;  %603 = vmatmul.mubr.bf16.gmra.mrb[8].mxu1 %v1660_v22 }
  0x8b   : > { %532 = vmatprep.mubr.bf16.mxu0 %v1839_v0  ;;  %612 = vmatprep.mubr.bf16.mxu1 %v1839_v0 }
  0x92   : > { %533 = vmatmul.mubr.bf16.gmra.mrb[12].mxu0 %v1661_v23  ;;  %613 = vmatmul.mubr.bf16.gmra.mrb[12].mxu1 %v1662_v24 }
  0x93   : > { %542 = vmatprep.mubr.bf16.mxu0 %v1839_v0  ;;  %622 = vmatprep.mubr.bf16.mxu1 %v1839_v0 }
  0x9a   : > { %543 = vmatmul.mubr.bf16.gmra.mrb[16].mxu0 %v1663_v25  ;;  %623 = vmatmul.mubr.bf16.gmra.mrb[16].mxu1 %v1664_v26 }
  0x9b   : > { %552 = vmatprep.mubr.bf16.mxu0 %v1839_v0  ;;  %632 = vmatprep.mubr.bf16.mxu1 %v1839_v0 }
  0xa2   : > { %553 = vmatmul.mubr.bf16.gmra.mrb[20].mxu0 %v1665_v27  ;;  %633 = vmatmul.mubr.bf16.gmra.mrb[20].mxu1 %v1666_v28 }
  0xa3   : > { %562 = vmatprep.mubr.bf16.mxu0 %v1839_v0  ;;  %642 = vmatprep.mubr.bf16.mxu1 %v1839_v0 }
  0xaa   : > { %563 = vmatmul.mubr.bf16.gmra.mrb[24].mxu0 %v1667_v29  ;;  %643 = vmatmul.mubr.bf16.gmra.mrb[24].mxu1 %v1668_v30 }
  0xab   : > { %572 = vmatprep.mubr.bf16.mxu0 %v1839_v0  ;;  %652 = vmatprep.mubr.bf16.mxu1 %v1839_v0 }
  0xb2   : > { %573 = vmatmul.mubr.bf16.gmra.mrb[28].mxu0 %v1669_v31  ;;  %653 = vmatmul.mubr.bf16.gmra.mrb[28].mxu1 %v1670_v32 }
 0x14d   : > { %v504_v33 = vpop.f32.mrb[0].mxu0  ;;  %v584_v34 = vpop.f32.mrb[0].mxu1 }
 0x14e   : > { %v506_v35 = vpop.f32.mrb[1].mxu0  ;;  %v586_v37 = vpop.f32.mrb[1].mxu1 }
 0x14f   : > { %v508_v38 = vpop.f32.mrb[2].mxu0  ;;  %v588_v39 = vpop.f32.mrb[2].mxu1  ;;  %v830_v44 = vadd.f32 %v2052_v36, %v506_v35  ;;  %v846_v45 = vadd.f32 %v2052_v36, %v586_v37 }
 0x150   : > { %v1359_v40 = vpack.c.bf16 %v508_v38, %v504_v33  ;;  %v1399_v41 = vpack.c.bf16 %v588_v39, %v584_v34  ;;  %v510_v42 = vpop.f32.mrb[3].mxu0  ;;  %v590_v43 = vpop.f32.mrb[3].mxu1 }
 0x151   : > { %v831_v46 = vadd.f32 %v2052_v36, %v510_v42  ;;  %v847_v47 = vadd.f32 %v2052_v36, %v590_v43 }
 0x152   : > { %1360 = vst [vmem:[%s2059_s9] sm:$0xff] %v1359_v40   ;;  %1523 = vst [vmem:[%s2059_s9 + $0x40] sm:$0xff] %v1399_v41  }
 0x153   : > { %v1439_v48 = vpack.c.bf16 %v831_v46, %v830_v44  ;;  %v1479_v49 = vpack.c.bf16 %v847_v47, %v846_v45 }
 0x155   : > { %1440 = vst [vmem:[%s2064_s28] sm:$0xff] %v1439_v48   ;;  %1538 = vst [vmem:[%s2064_s28 + $0x40] sm:$0xff] %v1479_v49   ;;  %v514_v50 = vpop.f32.mrb[4].mxu0  ;;  %v594_v51 = vpop.f32.mrb[4].mxu1 }
 0x156   : > { %v516_v52 = vpop.f32.mrb[5].mxu0  ;;  %v596_v53 = vpop.f32.mrb[5].mxu1 }
 0x157   : > { %v518_v54 = vpop.f32.mrb[6].mxu0  ;;  %v598_v55 = vpop.f32.mrb[6].mxu1  ;;  %v832_v60 = vadd.f32 %v2052_v36, %v516_v52  ;;  %v848_v61 = vadd.f32 %v2052_v36, %v596_v53 }
 0x158   : > { %v1364_v56 = vpack.c.bf16 %v518_v54, %v514_v50  ;;  %v1404_v57 = vpack.c.bf16 %v598_v55, %v594_v51  ;;  %v520_v58 = vpop.f32.mrb[7].mxu0  ;;  %v600_v59 = vpop.f32.mrb[7].mxu1 }
 0x159   : > { %v833_v62 = vadd.f32 %v2052_v36, %v520_v58  ;;  %v849_v63 = vadd.f32 %v2052_v36, %v600_v59 }
 0x15a   : > { %1516 = vst [vmem:[%s2059_s9 + $0x8] sm:$0xff] %v1364_v56   ;;  %1524 = vst [vmem:[%s2059_s9 + $0x48] sm:$0xff] %v1404_v57  }
 0x15b   : > { %v1444_v0 = vpack.c.bf16 %v833_v62, %v832_v60  ;;  %v1484_v1 = vpack.c.bf16 %v849_v63, %v848_v61 }
 0x15d   : > { %1531 = vst [vmem:[%s2064_s28 + $0x8] sm:$0xff] %v1444_v0   ;;  %1539 = vst [vmem:[%s2064_s28 + $0x48] sm:$0xff] %v1484_v1   ;;  %v524_v2 = vpop.f32.mrb[8].mxu0  ;;  %v604_v3 = vpop.f32.mrb[8].mxu1 }
 0x15e   : > { %v526_v4 = vpop.f32.mrb[9].mxu0  ;;  %v606_v5 = vpop.f32.mrb[9].mxu1 }
 0x15f   : > { %v528_v6 = vpop.f32.mrb[10].mxu0  ;;  %v608_v7 = vpop.f32.mrb[10].mxu1  ;;  %v834_v12 = vadd.f32 %v2052_v36, %v526_v4  ;;  %v850_v13 = vadd.f32 %v2052_v36, %v606_v5 }
 0x160   : > { %v1369_v8 = vpack.c.bf16 %v528_v6, %v524_v2  ;;  %v1409_v9 = vpack.c.bf16 %v608_v7, %v604_v3  ;;  %v530_v10 = vpop.f32.mrb[11].mxu0  ;;  %v610_v11 = vpop.f32.mrb[11].mxu1 }
 0x161   : > { %v835_v14 = vadd.f32 %v2052_v36, %v530_v10  ;;  %v851_v15 = vadd.f32 %v2052_v36, %v610_v11 }
 0x162   : > { %1517 = vst [vmem:[%s2059_s9 + $0x10] sm:$0xff] %v1369_v8   ;;  %1525 = vst [vmem:[%s2059_s9 + $0x50] sm:$0xff] %v1409_v9  }
 0x163   : > { %v1449_v16 = vpack.c.bf16 %v835_v14, %v834_v12  ;;  %v1489_v17 = vpack.c.bf16 %v851_v15, %v850_v13 }
 0x165   : > { %1532 = vst [vmem:[%s2064_s28 + $0x10] sm:$0xff] %v1449_v16   ;;  %1540 = vst [vmem:[%s2064_s28 + $0x50] sm:$0xff] %v1489_v17   ;;  %v534_v18 = vpop.f32.mrb[12].mxu0  ;;  %v614_v19 = vpop.f32.mrb[12].mxu1 }
 0x166   : > { %v536_v20 = vpop.f32.mrb[13].mxu0  ;;  %v616_v21 = vpop.f32.mrb[13].mxu1 }
 0x167   : > { %v538_v22 = vpop.f32.mrb[14].mxu0  ;;  %v618_v23 = vpop.f32.mrb[14].mxu1  ;;  %v836_v28 = vadd.f32 %v2052_v36, %v536_v20  ;;  %v852_v29 = vadd.f32 %v2052_v36, %v616_v21 }
 0x168   : > { %v1374_v24 = vpack.c.bf16 %v538_v22, %v534_v18  ;;  %v1414_v25 = vpack.c.bf16 %v618_v23, %v614_v19  ;;  %v540_v26 = vpop.f32.mrb[15].mxu0  ;;  %v620_v27 = vpop.f32.mrb[15].mxu1 }
 0x169   : > { %v837_v30 = vadd.f32 %v2052_v36, %v540_v26  ;;  %v853_v31 = vadd.f32 %v2052_v36, %v620_v27 }
 0x16a   : > { %1518 = vst [vmem:[%s2059_s9 + $0x18] sm:$0xff] %v1374_v24   ;;  %1526 = vst [vmem:[%s2059_s9 + $0x58] sm:$0xff] %v1414_v25  }
 0x16b   : > { %v1454_v32 = vpack.c.bf16 %v837_v30, %v836_v28  ;;  %v1494_v33 = vpack.c.bf16 %v853_v31, %v852_v29 }
 0x16d   : > { %1533 = vst [vmem:[%s2064_s28 + $0x18] sm:$0xff] %v1454_v32   ;;  %1541 = vst [vmem:[%s2064_s28 + $0x58] sm:$0xff] %v1494_v33   ;;  %v544_v34 = vpop.f32.mrb[16].mxu0  ;;  %v624_v35 = vpop.f32.mrb[16].mxu1 }
 0x16e   : > { %v546_v37 = vpop.f32.mrb[17].mxu0  ;;  %v626_v38 = vpop.f32.mrb[17].mxu1 }
 0x16f   : > { %v548_v39 = vpop.f32.mrb[18].mxu0  ;;  %v628_v40 = vpop.f32.mrb[18].mxu1  ;;  %v838_v45 = vadd.f32 %v2052_v36, %v546_v37  ;;  %v854_v46 = vadd.f32 %v2052_v36, %v626_v38 }
 0x170   : > { %v1379_v41 = vpack.c.bf16 %v548_v39, %v544_v34  ;;  %v1419_v42 = vpack.c.bf16 %v628_v40, %v624_v35  ;;  %v550_v43 = vpop.f32.mrb[19].mxu0  ;;  %v630_v44 = vpop.f32.mrb[19].mxu1 }
 0x171   : > { %v839_v47 = vadd.f32 %v2052_v36, %v550_v43  ;;  %v855_v48 = vadd.f32 %v2052_v36, %v630_v44 }
 0x172   : > { %1519 = vst [vmem:[%s2059_s9 + $0x20] sm:$0xff] %v1379_v41   ;;  %1527 = vst [vmem:[%s2059_s9 + $0x60] sm:$0xff] %v1419_v42  }
 0x173   : > { %v1459_v49 = vpack.c.bf16 %v839_v47, %v838_v45  ;;  %v1499_v50 = vpack.c.bf16 %v855_v48, %v854_v46 }
 0x175   : > { %1534 = vst [vmem:[%s2064_s28 + $0x20] sm:$0xff] %v1459_v49   ;;  %1542 = vst [vmem:[%s2064_s28 + $0x60] sm:$0xff] %v1499_v50   ;;  %v554_v51 = vpop.f32.mrb[20].mxu0  ;;  %v634_v52 = vpop.f32.mrb[20].mxu1 }
 0x176   : > { %v556_v53 = vpop.f32.mrb[21].mxu0  ;;  %v636_v54 = vpop.f32.mrb[21].mxu1 }
 0x177   : > { %v558_v55 = vpop.f32.mrb[22].mxu0  ;;  %v638_v56 = vpop.f32.mrb[22].mxu1  ;;  %v840_v61 = vadd.f32 %v2052_v36, %v556_v53  ;;  %v856_v62 = vadd.f32 %v2052_v36, %v636_v54 }
 0x178   : > { %v1384_v57 = vpack.c.bf16 %v558_v55, %v554_v51  ;;  %v1424_v58 = vpack.c.bf16 %v638_v56, %v634_v52  ;;  %v560_v59 = vpop.f32.mrb[23].mxu0  ;;  %v640_v60 = vpop.f32.mrb[23].mxu1 }
 0x179   : > { %v841_v63 = vadd.f32 %v2052_v36, %v560_v59  ;;  %v857_v0 = vadd.f32 %v2052_v36, %v640_v60 }
 0x17a   : > { %1520 = vst [vmem:[%s2059_s9 + $0x28] sm:$0xff] %v1384_v57   ;;  %1528 = vst [vmem:[%s2059_s9 + $0x68] sm:$0xff] %v1424_v58  }
 0x17b   : > { %v1464_v1 = vpack.c.bf16 %v841_v63, %v840_v61  ;;  %v1504_v2 = vpack.c.bf16 %v857_v0, %v856_v62 }
 0x17d   : > { %1535 = vst [vmem:[%s2064_s28 + $0x28] sm:$0xff] %v1464_v1   ;;  %1543 = vst [vmem:[%s2064_s28 + $0x68] sm:$0xff] %v1504_v2   ;;  %v564_v3 = vpop.f32.mrb[24].mxu0  ;;  %v644_v4 = vpop.f32.mrb[24].mxu1 }
 0x17e   : > { %v566_v5 = vpop.f32.mrb[25].mxu0  ;;  %v646_v6 = vpop.f32.mrb[25].mxu1 }
 0x17f   : > { %v568_v7 = vpop.f32.mrb[26].mxu0  ;;  %v648_v8 = vpop.f32.mrb[26].mxu1  ;;  %v842_v13 = vadd.f32 %v2052_v36, %v566_v5  ;;  %v858_v14 = vadd.f32 %v2052_v36, %v646_v6 }
 0x180   : > { %v1389_v9 = vpack.c.bf16 %v568_v7, %v564_v3  ;;  %v1429_v10 = vpack.c.bf16 %v648_v8, %v644_v4  ;;  %v570_v11 = vpop.f32.mrb[27].mxu0  ;;  %v650_v12 = vpop.f32.mrb[27].mxu1 }
 0x181   : > { %v843_v15 = vadd.f32 %v2052_v36, %v570_v11  ;;  %v859_v16 = vadd.f32 %v2052_v36, %v650_v12 }
 0x182   : > { %1521 = vst [vmem:[%s2059_s9 + $0x30] sm:$0xff] %v1389_v9   ;;  %1529 = vst [vmem:[%s2059_s9 + $0x70] sm:$0xff] %v1429_v10  }
 0x183   : > { %v1469_v17 = vpack.c.bf16 %v843_v15, %v842_v13  ;;  %v1509_v18 = vpack.c.bf16 %v859_v16, %v858_v14 }
 0x185   : > { %1536 = vst [vmem:[%s2064_s28 + $0x30] sm:$0xff] %v1469_v17   ;;  %1544 = vst [vmem:[%s2064_s28 + $0x70] sm:$0xff] %v1509_v18   ;;  %v574_v19 = vpop.f32.mrb[28].mxu0  ;;  %v654_v20 = vpop.f32.mrb[28].mxu1 }
 0x186   : > { %v576_v21 = vpop.f32.mrb[29].mxu0  ;;  %v656_v22 = vpop.f32.mrb[29].mxu1 }
 0x187   : > { %v578_v23 = vpop.f32.mrb[30].mxu0  ;;  %v658_v24 = vpop.f32.mrb[30].mxu1  ;;  %v844_v29 = vadd.f32 %v2052_v36, %v576_v21  ;;  %v860_v30 = vadd.f32 %v2052_v36, %v656_v22 }
 0x188   : > { %v1394_v25 = vpack.c.bf16 %v578_v23, %v574_v19  ;;  %v1434_v26 = vpack.c.bf16 %v658_v24, %v654_v20  ;;  %v580_v27 = vpop.f32.mrb[31].mxu0  ;;  %v660_v28 = vpop.f32.mrb[31].mxu1 }
 0x189   : > { %v845_v31 = vadd.f32 %v2052_v36, %v580_v27  ;;  %v861_v32 = vadd.f32 %v2052_v36, %v660_v28 }
 0x18a   : > { %1522 = vst [vmem:[%s2059_s9 + $0x38] sm:$0xff] %v1394_v25   ;;  %1530 = vst [vmem:[%s2059_s9 + $0x78] sm:$0xff] %v1434_v26  }
 0x18b   : > { %v1474_v33 = vpack.c.bf16 %v845_v31, %v844_v29  ;;  %v1514_v34 = vpack.c.bf16 %v861_v32, %v860_v30 }
 0x18c   : > { %1742 = shalt.err (!%p1739_p7)
}
 0x18d   : > { %s1743_s23 = scalar_lea.hbm %s2121_s7, 2048  ;;  %s1747_s6 = scalar_lea.hbm %s2215_s3, 12288 }
 0x18e   : > { %p1744_p9 = scmp.ne.s32.totalorder %s2121_s7, %s1743_s23  ;;  %p1748_p5 = scmp.lt.u32.totalorder %s2121_s7, %s2215_s3 }
 0x18f   : > { %p1749_p10 = scmp.lt.u32.totalorder %s1747_s6, %s1743_s23  ;;  %p1751_p1 = scmp.lt.u32.totalorder %s1743_s23, %s2121_s7 }
 0x190   : > { %p1745_p11 = pnand %p1744_p9, %p1952_p12 }
 0x191   : > { %p1750_p2 = por %p1749_p10, %p1748_p5 }
 0x192   : > { %p1746_p0 = pneg %p1745_p11 }
 0x193   : > { %p1752_p4 = por %p1751_p1, %p1750_p2 }
 0x195   : > { %p1753_p6 = pnand %p1752_p4, %p1746_p0 }
 0x197   : > { %1756 = shalt.err (!%p1753_p6)
}
 0x198   : > { %s1841_s8 = smov 64   ;;  %s1842_s13 = smov 4   ;;  %1537 = vst [vmem:[%s2064_s28 + $0x38] sm:$0xff] %v1474_v33   ;;  %1545 = vst [vmem:[%s2064_s28 + $0x78] sm:$0xff] %v1514_v34  }
 0x199   : > { %1568 = dma.vmem_to_hbm [thread:$0]  (%p1952_p12), %s2123_s10, 2048, %s2121_s7, %s1023_s11, %s1841_s8, %s1841_s8, %s1842_s13  }
 0x19a   : > { %s1028_s14 = scalar_lea.sflag [#allocation9], %s2000_s12  ;;  %s1757_s20 = scalar_lea.vmem %s2137_s19, 2048 }
 0x19b   : > { %p1758_p8 = scmp.ne.s32.totalorder %s2137_s19, %s1757_s20  ;;  %s1843_s21 = smov [#allocation8]  }
 0x19c   : > { %s1761_s23 = sshll.u32 %s1843_s21, 4  ;;  %s1762_s23 = int_to_ptr.vmem [resolvable:$false] %s1761_s23 }
 0x19d   : > { %p1759_p13 = pnand %p1758_p8, %p1952_p12  ;;  %s1763_s9 = scalar_lea.vmem %s1762_s23, 4096 }
 0x19e   : > { %p1764_p7 = scmp.lt.s32.totalorder %s2137_s19, %s1762_s23  ;;  %p1765_p9 = scmp.lt.s32.totalorder %s1763_s9, %s1757_s20 }
 0x19f   : > { %p1760_p3 = pneg %p1759_p13 }
 0x1a0   : > { %p1766_p11 = por %p1765_p9, %p1764_p7 }
 0x1a2   : > { %p1767_p0 = pnand %p1766_p11, %p1760_p3 }
 0x1a4   : > { %1770 = shalt.err (!%p1767_p0)
}
 0x1a5   : > { %s1771_s28 = scalar_lea.hbm %s2135_s25, 2048  ;;  %s1775_s11 = scalar_lea.hbm %s2216_s4, 12288 }
 0x1a6   : > { %p1772_p5 = scmp.ne.s32.totalorder %s2135_s25, %s1771_s28  ;;  %p1776_p1 = scmp.lt.u32.totalorder %s2135_s25, %s2216_s4 }
 0x1a7   : > { %p1777_p4 = scmp.lt.u32.totalorder %s1775_s11, %s1771_s28  ;;  %p1779_p8 = scmp.lt.u32.totalorder %s1771_s28, %s2135_s25 }
 0x1a8   : > { %p1773_p10 = pnand %p1772_p5, %p1952_p12 }
 0x1a9   : > { %p1778_p6 = por %p1777_p4, %p1776_p1 }
 0x1aa   : > { %p1774_p2 = pneg %p1773_p10 }
 0x1ab   : > { %p1780_p13 = por %p1779_p8, %p1778_p6 }
 0x1ad   : > { %p1781_p3 = pnand %p1780_p13, %p1774_p2 }
 0x1af   : > { %1784 = shalt.err (!%p1781_p3)
}
 0x1b0   : > { %1569 = dma.vmem_to_hbm [thread:$0]  (%p1952_p12), %s2137_s19, 2048, %s2135_s25, %s1028_s14, %s1841_s8, %s1841_s8, %s1842_s13  }
 0x1b1 PF: > { %p1590_p7 = scmp.ge.s32.totalorder %s1831_s18, 2  ;;  %s1072_s5 = sand.u32 1, %s1819_s15  }
 0x1b2   : > { %p2231_p9 = scmp.ne.s32.totalorder %s2221_s22, 0  ;;  %s1073_s26 = scalar_lea.sflag [#allocation4], %s1072_s5 }
 0x1b4   : > { %p1581_p11 = pnand %p1590_p7, %p2231_p9 }
 0x1b6   : > { %1810 = dma.done.wait (!%p1581_p11), %s1073_s26, 2048  }
 0x1b7   : > { %1812 = vsyncadd (!%p1581_p11), %s1073_s26, 4294965248  ;;  %s1082_s30 = scalar_lea.sflag [#allocation9], %s1072_s5 }
 0x1b8   : > { %1814 = dma.done.wait (!%p1581_p11), %s1082_s30, 2048  }
 0x1b9   : > { %1816 = vsyncadd (!%p1581_p11), %s1082_s30, 4294965248  ;;  %p22_p12 = scmp.ge.s32.totalorder %s1922_s27, 8   ;;  %s2232_s15 = smov %s1823_s16 }
 0x1ba   : > { %s2233_s16 = smov %s1827_s17  ;;  %s2234_s17 = smov %s1948_s24 }
 0x1bb   : > { %s2235_s18 = smov %s1922_s27  ;;  %24 = sbr.rel (!%p22_p12) target bundleno = 8 (0x8), region = 98 }
 0x1c2   :  { %1087 = vsyncpa [#allocation3], 1 }
 0x1c3   :  { %1089 = vsyncpa [#allocation3 + $0x1], 1 }
 0x1c4   :  { %1090 = vsyncpa [#allocation6], 1 }
 0x1c5   :  { %1091 = vsyncpa [#allocation4], 1 }
 0x1c6   :  { %1093 = vsyncpa [#allocation4 + $0x1], 1 }
 0x1c7   :  { %1094 = vsyncpa [#allocation9], 1 }
 0x1c8   :  { %1096 = vsyncpa [#allocation9 + $0x1], 1 }

</bundles_post_ra>
